<compile_context>
chip_gen: v5e
topology: v5e:2x2
jax: 0.10.0
libtpu: 0.0.40
codegen_flags: <defaults>
</compile_context>

<pallas_src>
import functools

import jax
import jax.numpy as jnp
from jax import lax
from jax.experimental import pallas as pl
from jax.experimental.pallas import tpu as pltpu


# ----------------------------------------------------------------------------
# Helpers
# ----------------------------------------------------------------------------

def _round_up(x, m):
    return ((x + m - 1) // m) * m


def _choose_tiling(n, target, granule=128):
    """Pick a tile size and padded length for the spatial (N = H*W) axis.

    Returns (tile, n_padded): tile is a multiple of `granule` (128 keeps the
    (TQ, TK) score tile lane-dense and satisfies bf16 16-sublane packing),
    n_padded is a multiple of tile and the padding is always < tile.  Padded
    key rows are masked (-inf) inside the kernel; padded query rows are sliced
    off by the wrapper.  This replaces the old "fall back to untiled N" hazard.
    """
    target = max(granule, (int(target) // granule) * granule)
    if n <= target:
        t = _round_up(n, granule)
        return t, t
    for t in range(target, granule - 1, -granule):
        if n % t == 0:
            return t, n
    return target, _round_up(n, target)


def _vmem_cap_bytes():
    cap = 64 * 2 ** 20  # conservative fallback: v7x per-TC physical VMEM
    try:
        cap = int(getattr(pltpu.get_tpu_info(), "vmem_capacity_bytes", cap))
    except Exception:
        pass
    # Never request more than 75% of physical VMEM: leaves headroom for
    # compiler-internal scratch (the review's v7x concern) while still letting
    # v5e/v6e (128 MiB) run much larger tiles.
    return (3 * cap) // 4


def _vmem_limit(est_bytes):
    return int(min(max(2 * est_bytes, 24 * 2 ** 20), _vmem_cap_bytes()))


# ----------------------------------------------------------------------------
# Pass 1: fused 1x1-conv projection  x -> [feat_b | feat_c | feat_d]
# ----------------------------------------------------------------------------

def _proj_kernel(x_ref,            # VMEM (1, TP, C) f32
                 w_ref, b_ref,     # VMEM (C, 2*C8p + C) compute_dtype, (1, 2*C8p + C) f32
                 fb_ref, fc_ref, fd_ref,   # VMEM (1, TP, C8p/C8p/C) compute_dtype
                 *, c8p, compute_dtype):
    x = x_ref[0].astype(compute_dtype)                                        # (TP, C)
    y = jnp.dot(x, w_ref[...], preferred_element_type=jnp.float32) + b_ref[...]
    # Column order is [b | c | d] so every slice starts on a 128-lane boundary.
    fb_ref[0] = y[:, :c8p].astype(compute_dtype)
    fc_ref[0] = y[:, c8p:2 * c8p].astype(compute_dtype)
    fd_ref[0] = y[:, 2 * c8p:].astype(compute_dtype)


# ----------------------------------------------------------------------------
# Pass 2: flash-style position attention over projected features
# ----------------------------------------------------------------------------

def _pam_flash_kernel(alpha_ref,                 # SMEM (1,) f32
                      xq_ref,                    # VMEM (1, TQ, C) f32  (residual)
                      fb_ref,                    # VMEM (1, TQ, C8p) compute_dtype
                      fd_ref,                    # VMEM (1, TK, C)   compute_dtype
                      fc_ref,                    # VMEM (1, TK, C8p) compute_dtype
                      o_ref,                     # VMEM (1, TQ, C) f32
                      m_ref, l_ref, acc_ref,     # VMEM scratch (TQ,1)/(TQ,1)/(TQ,C) f32
                      *, n_valid, mask_kv, compute_dtype, recip_approx):
    tk = fc_ref.shape[1]
    ki = pl.program_id(2)

    # ---- per-(batch, q-tile) init of the online-softmax state.
    @pl.when(ki == 0)
    def _():
        m_ref[...] = jnp.full_like(m_ref, -jnp.inf)
        l_ref[...] = jnp.zeros_like(l_ref)
        acc_ref[...] = jnp.zeros_like(acc_ref)

    # ---- scores: contract the (padded) C8 dim of both operands, no transpose.
    s = lax.dot_general(fb_ref[0], fc_ref[0],
                        dimension_numbers=(((1,), (1,)), ((), ())),
                        preferred_element_type=jnp.float32)                   # (TQ, TK)
    if mask_kv:
        # Padded key rows (global index >= n_valid) must not receive softmax mass.
        kv_idx = ki * tk + lax.broadcasted_iota(jnp.int32, (1, tk), 1)
        s = jnp.where(kv_idx < n_valid, s, -jnp.inf)

    # ---- online softmax (normalization deferred to finalize); f32 exp (v5e-safe).
    m_prev = m_ref[...]
    m_new = jnp.maximum(m_prev, jnp.max(s, axis=-1, keepdims=True))
    corr = jnp.exp(m_prev - m_new)
    p = jnp.exp(s - m_new)
    l_ref[...] = corr * l_ref[...] + jnp.sum(p, axis=-1, keepdims=True)
    acc_ref[...] = corr * acc_ref[...] + jnp.dot(
        p.astype(compute_dtype), fd_ref[0], preferred_element_type=jnp.float32)
    m_ref[...] = m_new

    # ---- finalize: deferred normalization + residual (all f32).
    @pl.when(ki == pl.num_programs(2) - 1)
    def _():
        feat_e = acc_ref[...] * pl.reciprocal(l_ref[...], approx=recip_approx)
        o_ref[0] = alpha_ref[0] * feat_e + xq_ref[0]


# ----------------------------------------------------------------------------
# Wrappers
# ----------------------------------------------------------------------------

def position_attention_forward_bnc(x_bnc, params, *, compute_dtype=jnp.bfloat16,
                                   tile_target=512):
    """Position attention on channels-last input.  x_bnc: (B, N, C) f32."""
    B, N, C = x_bnc.shape
    C8 = params["wb"].shape[0]
    C8p = max(128, _round_up(C8, 128))          # lane-pad conv_b/conv_c width
    cd = jnp.dtype(compute_dtype)
    f32 = 4

    TILE, Np = _choose_tiling(N, tile_target)
    TQ = TK = TILE
    mask_kv = Np != N

    x = x_bnc.astype(jnp.float32)
    if mask_kv:
        x = jnp.pad(x, ((0, 0), (0, Np - N), (0, 0)))

    # Fused, lane-padded projection weight: [conv_b | conv_c | conv_d].
    def _pad_t(w):      # (C8, C) -> (C, C8p), zero-padded output channels
        return jnp.pad(w.T, ((0, 0), (0, C8p - C8)))

    w_all = jnp.concatenate(
        [_pad_t(params["wb"]), _pad_t(params["wc"]), params["wd"].T],
        axis=1).astype(compute_dtype)                                          # (C, 2*C8p + C)
    b_all = jnp.concatenate(
        [jnp.pad(params["bb"], (0, C8p - C8)),
         jnp.pad(params["bc"], (0, C8p - C8)),
         params["bd"]]).reshape(1, 2 * C8p + C).astype(jnp.float32)
    alpha = params["alpha"].reshape(1).astype(jnp.float32)

    Wtot = 2 * C8p + C

    # ---------------- pass 1: project x once (removes redundant KV recompute).
    proj_est = (2 * TQ * C * f32                              # x block
                + 2 * C * Wtot * cd.itemsize + 2 * Wtot * f32  # resident weight/bias
                + 2 * TQ * Wtot * (f32 + cd.itemsize)          # temp + casts
                + 2 * (2 * TQ * C8p + TQ * C) * cd.itemsize)   # output blocks
    fb_all, fc_all, fd_all = pl.pallas_call(
        functools.partial(_proj_kernel, c8p=C8p, compute_dtype=compute_dtype),
        out_shape=(jax.ShapeDtypeStruct((B, Np, C8p), compute_dtype),
                   jax.ShapeDtypeStruct((B, Np, C8p), compute_dtype),
                   jax.ShapeDtypeStruct((B, Np, C), compute_dtype)),
        grid_spec=pltpu.PrefetchScalarGridSpec(
            num_scalar_prefetch=0,
            grid=(B, Np // TQ),
            in_specs=[
                pl.BlockSpec((1, TQ, C), lambda b, i: (b, i, 0)),     # x tile
                pl.BlockSpec((C, Wtot), lambda b, i: (0, 0)),         # weight (resident)
                pl.BlockSpec((1, Wtot), lambda b, i: (0, 0)),         # bias   (resident)
            ],
            out_specs=[
                pl.BlockSpec((1, TQ, C8p), lambda b, i: (b, i, 0)),   # feat_b
                pl.BlockSpec((1, TQ, C8p), lambda b, i: (b, i, 0)),   # feat_c
                pl.BlockSpec((1, TQ, C), lambda b, i: (b, i, 0)),     # feat_d
            ],
        ),
        compiler_params=pltpu.CompilerParams(
            dimension_semantics=("parallel", "parallel"),
            vmem_limit_bytes=_vmem_limit(proj_est),
        ),
    )(x, w_all, b_all)

    # ---------------- pass 2: flash attention over projected features.
    flash_est = (2 * TQ * C * f32                       # xq (residual)
                 + 2 * TQ * C8p * cd.itemsize           # feat_b tile
                 + 2 * TK * C * cd.itemsize             # feat_d tile
                 + 2 * TK * C8p * cd.itemsize           # feat_c tile
                 + 2 * TQ * C * f32                     # output tile
                 + TQ * C * f32 + 4 * TQ * f32          # acc, m, l scratch
                 + 3 * TQ * TK * f32)                   # score temporaries
    kernel = functools.partial(
        _pam_flash_kernel,
        n_valid=N, mask_kv=mask_kv, compute_dtype=compute_dtype,
        recip_approx=(cd != jnp.dtype(jnp.float32)))

    out = pl.pallas_call(
        kernel,
        out_shape=jax.ShapeDtypeStruct((B, Np, C), jnp.float32),
        grid_spec=pltpu.PrefetchScalarGridSpec(
            num_scalar_prefetch=0,
            grid=(B, Np // TQ, Np // TK),
            in_specs=[
                pl.BlockSpec(memory_space=pltpu.SMEM),                        # alpha
                pl.BlockSpec((1, TQ, C), lambda b, qi, ki: (b, qi, 0)),       # xq (residual)
                pl.BlockSpec((1, TQ, C8p), lambda b, qi, ki: (b, qi, 0)),     # feat_b tile
                pl.BlockSpec((1, TK, C), lambda b, qi, ki: (b, ki, 0)),       # feat_d tile
                pl.BlockSpec((1, TK, C8p), lambda b, qi, ki: (b, ki, 0)),     # feat_c tile
            ],
            out_specs=pl.BlockSpec((1, TQ, C), lambda b, qi, ki: (b, qi, 0)),
            scratch_shapes=[
                pltpu.VMEM((TQ, 1), jnp.float32),       # running max  m
                pltpu.VMEM((TQ, 1), jnp.float32),       # running sum  l
                pltpu.VMEM((TQ, C), jnp.float32),       # output accumulator
            ],
        ),
        compiler_params=pltpu.CompilerParams(
            dimension_semantics=("parallel", "parallel", "arbitrary"),
            vmem_limit_bytes=_vmem_limit(flash_est),
        ),
    )(alpha, x, fb_all, fd_all, fc_all)

    if mask_kv:
        out = out[:, :N, :]
    return out


def position_attention_forward(x_nchw, params, **kwargs):
    """NCHW entry point matching the PyTorch module.  x_nchw: (B, C, H, W) f32.

    The NCHW <-> (B, N, C) transposes are pure layout glue; channels-last
    pipelines should call position_attention_forward_bnc directly.
    """
    B, C, H, W = x_nchw.shape
    N = H * W
    x = jnp.transpose(x_nchw.reshape(B, C, N), (0, 2, 1))
    out = position_attention_forward_bnc(x, params, **kwargs)
    return jnp.transpose(out, (0, 2, 1)).reshape(B, C, H, W)


# ----------------------------------------------------------------------------
# Params / reference
# ----------------------------------------------------------------------------

def init_params(key, in_channels, alpha_value=0.0):
    """Parameter shapes matching the PyTorch module (1x1 convs == matmuls)."""
    C = in_channels
    C8 = C // 8
    ks = jax.random.split(key, 6)
    bound = 1.0 / (C ** 0.5)
    return {
        "wb": jax.random.uniform(ks[0], (C8, C), jnp.float32, -bound, bound),
        "bb": jax.random.uniform(ks[1], (C8,), jnp.float32, -bound, bound),
        "wc": jax.random.uniform(ks[2], (C8, C), jnp.float32, -bound, bound),
        "bc": jax.random.uniform(ks[3], (C8,), jnp.float32, -bound, bound),
        "wd": jax.random.uniform(ks[4], (C, C), jnp.float32, -bound, bound),
        "bd": jax.random.uniform(ks[5], (C,), jnp.float32, -bound, bound),
        "alpha": jnp.array([alpha_value], jnp.float32),
    }


def reference_forward(x, params):
    """Pure-JAX reference mirroring the PyTorch forward exactly (f32)."""
    B, C, H, W = x.shape
    N = H * W
    xf = x.reshape(B, C, N)
    fb = jnp.einsum("oc,bcn->bon", params["wb"], xf) + params["bb"][None, :, None]
    fc = jnp.einsum("oc,bcn->bon", params["wc"], xf) + params["bc"][None, :, None]
    fd = jnp.einsum("oc,bcn->bon", params["wd"], xf) + params["bd"][None, :, None]
    attn = jax.nn.softmax(jnp.einsum("bcn,bcm->bnm", fb, fc), axis=-1)
    fe = jnp.einsum("bcm,bnm->bcn", fd, attn).reshape(B, C, H, W)
    return params["alpha"][0] * fe + x


if __name__ == "__main__":
    key = jax.random.PRNGKey(0)
    k_x, k_p, k_x2 = jax.random.split(key, 3)

    # Small smoke-test shapes: B=2, C=32 (C8=4), H=W=16 -> N=256.
    # tile_target=128 forces a 2x2 query/KV tiling so the online-softmax
    # accumulation path is exercised.
    B, C, H, W = 2, 32, 16, 16
    x = jax.random.normal(k_x, (B, C, H, W), jnp.float32)
    params = init_params(k_p, C, alpha_value=0.3)
    ref = reference_forward(x, params)

    # 1) Exact-semantics check: pure f32 compute path.
    out_f32 = jax.block_until_ready(
        position_attention_forward(x, params, compute_dtype=jnp.float32,
                                   tile_target=128))
    assert jnp.allclose(out_f32, ref, atol=1e-4, rtol=1e-4)

    # 2) Performance path: bf16 projected features / MXU operands.
    out_bf16 = jax.block_until_ready(
        position_attention_forward(x, params, compute_dtype=jnp.bfloat16,
                                   tile_target=128))
    assert jnp.allclose(out_bf16, ref, atol=1e-1, rtol=1e-1)

    # 3) PyTorch default init (alpha == 0): output reduces to the residual.
    params0 = init_params(k_p, C, alpha_value=0.0)
    out0 = jax.block_until_ready(
        position_attention_forward(x, params0, tile_target=128))
    assert jnp.allclose(out0, reference_forward(x, params0), atol=1e-4, rtol=1e-4)

    # 4) Ragged spatial size (H=W=12 -> N=144): exercises N-padding + KV masking.
    x2 = jax.random.normal(k_x2, (1, C, 12, 12), jnp.float32)
    out2 = jax.block_until_ready(
        position_attention_forward(x2, params, compute_dtype=jnp.float32,
                                   tile_target=128))
    assert jnp.allclose(out2, reference_forward(x2, params), atol=1e-4, rtol=1e-4)

    print("KERNEL_OK")
</pallas_src>

<mosaic_0001>
module attributes {stable_mosaic.version = 11 : i64} {
  func.func @_proj_kernel(%arg0: i32, %arg1: i32, %arg2: memref<1x128x32xf32, #tpu.memory_space<vmem>>, %arg3: memref<32x288xf32, #tpu.memory_space<vmem>>, %arg4: memref<1x288xf32, #tpu.memory_space<vmem>>, %arg5: memref<1x128x128xf32, #tpu.memory_space<vmem>>, %arg6: memref<1x128x128xf32, #tpu.memory_space<vmem>>, %arg7: memref<1x128x32xf32, #tpu.memory_space<vmem>>) attributes {dimension_semantics = [#tpu.dimension_semantics<parallel>, #tpu.dimension_semantics<parallel>], iteration_bounds = array<i64: 2, 2>, scalar_prefetch = 0 : i64, scratch_operands = 0 : i64, tpu.core_type = #tpu.core_type<tc>, window_params = [{transform_indices = @transform_0, window_bounds = array<i64: 1, 128, 32>}, {pipeline_mode = #tpu.pipeline_mode<synchronous>, transform_indices = @transform_1, window_bounds = array<i64: 32, 288>}, {pipeline_mode = #tpu.pipeline_mode<synchronous>, transform_indices = @transform_2, window_bounds = array<i64: 1, 288>}, {transform_indices = @transform_3, window_bounds = array<i64: 1, 128, 128>}, {transform_indices = @transform_4, window_bounds = array<i64: 1, 128, 128>}, {transform_indices = @transform_5, window_bounds = array<i64: 1, 128, 32>}]} {
    %c0 = arith.constant 0 : index
    %c0_0 = arith.constant 0 : index
    %c0_1 = arith.constant 0 : index
    %0 = vector.load %arg2[%c0, %c0_0, %c0_1] : memref<1x128x32xf32, #tpu.memory_space<vmem>>, vector<1x128x32xf32>
    %1 = vector.shape_cast %0 : vector<1x128x32xf32> to vector<128x32xf32>
    %c0_2 = arith.constant 0 : index
    %c0_3 = arith.constant 0 : index
    %2 = vector.load %arg3[%c0_2, %c0_3] : memref<32x288xf32, #tpu.memory_space<vmem>>, vector<32x288xf32>
    %cst = arith.constant dense<0.000000e+00> : vector<128x288xf32>
    %3 = tpu.matmul %1, %2, %cst {dimension_numbers = #tpu.dot_dimension_numbers<[1], [0], [0], [1], [0, 0, 1, 1], [], []>} : vector<128x32xf32>, vector<32x288xf32>, vector<128x288xf32> -> vector<128x288xf32>
    %c0_4 = arith.constant 0 : index
    %c0_5 = arith.constant 0 : index
    %4 = vector.load %arg4[%c0_4, %c0_5] : memref<1x288xf32, #tpu.memory_space<vmem>>, vector<1x288xf32>
    %5 = vector.broadcast %4 : vector<1x288xf32> to vector<128x288xf32>
    %6 = arith.addf %3, %5 : vector<128x288xf32>
    %7 = vector.extract_strided_slice %6 {offsets = [0, 0], sizes = [128, 128], strides = [1, 1]} : vector<128x288xf32> to vector<128x128xf32>
    %c0_6 = arith.constant 0 : index
    %c0_7 = arith.constant 0 : index
    %c0_8 = arith.constant 0 : index
    %8 = vector.load %arg5[%c0_6, %c0_7, %c0_8] : memref<1x128x128xf32, #tpu.memory_space<vmem>>, vector<1x128x128xf32>
    %9 = vector.shape_cast %8 : vector<1x128x128xf32> to vector<128x128xf32>
    %10 = vector.shape_cast %7 : vector<128x128xf32> to vector<1x128x128xf32>
    tpu.vector_store %arg5[%c0_6, %c0_7, %c0_8], %10 {strides = array<i32>} : memref<1x128x128xf32, #tpu.memory_space<vmem>>, vector<1x128x128xf32>,
    %11 = vector.extract_strided_slice %6 {offsets = [0, 128], sizes = [128, 128], strides = [1, 1]} : vector<128x288xf32> to vector<128x128xf32>
    %c0_9 = arith.constant 0 : index
    %c0_10 = arith.constant 0 : index
    %c0_11 = arith.constant 0 : index
    %12 = vector.load %arg6[%c0_9, %c0_10, %c0_11] : memref<1x128x128xf32, #tpu.memory_space<vmem>>, vector<1x128x128xf32>
    %13 = vector.shape_cast %12 : vector<1x128x128xf32> to vector<128x128xf32>
    %14 = vector.shape_cast %11 : vector<128x128xf32> to vector<1x128x128xf32>
    tpu.vector_store %arg6[%c0_9, %c0_10, %c0_11], %14 {strides = array<i32>} : memref<1x128x128xf32, #tpu.memory_space<vmem>>, vector<1x128x128xf32>,
    %15 = vector.extract_strided_slice %6 {offsets = [0, 256], sizes = [128, 32], strides = [1, 1]} : vector<128x288xf32> to vector<128x32xf32>
    %c0_12 = arith.constant 0 : index
    %c0_13 = arith.constant 0 : index
    %c0_14 = arith.constant 0 : index
    %16 = vector.load %arg7[%c0_12, %c0_13, %c0_14] : memref<1x128x32xf32, #tpu.memory_space<vmem>>, vector<1x128x32xf32>
    %17 = vector.shape_cast %16 : vector<1x128x32xf32> to vector<128x32xf32>
    %18 = vector.shape_cast %15 : vector<128x32xf32> to vector<1x128x32xf32>
    tpu.vector_store %arg7[%c0_12, %c0_13, %c0_14], %18 {strides = array<i32>} : memref<1x128x32xf32, #tpu.memory_space<vmem>>, vector<1x128x32xf32>,
    return
  }
  func.func @transform_0(%arg0: i32, %arg1: i32) -> (i32, i32, i32) {
    %c0_i32 = arith.constant 0 : i32
    %c0_i32_0 = arith.constant 0 : i32
    return %arg0, %arg1, %c0_i32 : i32, i32, i32
  }
  func.func @transform_1(%arg0: i32, %arg1: i32) -> (i32, i32) {
    %c0_i32 = arith.constant 0 : i32
    %c0_i32_0 = arith.constant 0 : i32
    %c0_i32_1 = arith.constant 0 : i32
    return %c0_i32, %c0_i32_0 : i32, i32
  }
  func.func @transform_2(%arg0: i32, %arg1: i32) -> (i32, i32) {
    %c0_i32 = arith.constant 0 : i32
    %c0_i32_0 = arith.constant 0 : i32
    %c0_i32_1 = arith.constant 0 : i32
    return %c0_i32, %c0_i32_0 : i32, i32
  }
  func.func @transform_3(%arg0: i32, %arg1: i32) -> (i32, i32, i32) {
    %c0_i32 = arith.constant 0 : i32
    %c0_i32_0 = arith.constant 0 : i32
    return %arg0, %arg1, %c0_i32 : i32, i32, i32
  }
  func.func @transform_4(%arg0: i32, %arg1: i32) -> (i32, i32, i32) {
    %c0_i32 = arith.constant 0 : i32
    %c0_i32_0 = arith.constant 0 : i32
    return %arg0, %arg1, %c0_i32 : i32, i32, i32
  }
  func.func @transform_5(%arg0: i32, %arg1: i32) -> (i32, i32, i32) {
    %c0_i32 = arith.constant 0 : i32
    %c0_i32_0 = arith.constant 0 : i32
    return %arg0, %arg1, %c0_i32 : i32, i32, i32
  }
}

</mosaic_0001>

<bundles_post_ra>
// kernel: tpu_custom_call.1
= control target key start
LH: loop header
LB: loop body
LE: loop exit
PB: predicated region body
PF: predicated region fallthrough
CT: control target
= control target key end

     0   :  { %s1545_s0 = inlined_call_operand.vmem [shape: f32[2,256,32], index: 0, kind: input, shape index: {}]   ;;  %s1546_s1 = inlined_call_operand.vmem [shape: f32[32,288], index: 1, kind: input, shape index: {}]   ;;  %s1547_s2 = inlined_call_operand.vmem [shape: f32[1,288], index: 2, kind: input, shape index: {}]   ;;  %s1548_s3 = inlined_call_operand.hbm [shape: f32[2,256,128], index: 3, kind: output, shape index: {0}]   ;;  %s1549_s4 = inlined_call_operand.hbm [shape: f32[2,256,128], index: 4, kind: output, shape index: {1}]   ;;  %s1550_s5 = inlined_call_operand.vmem [shape: f32[2,256,32], index: 5, kind: output, shape index: {2}]  }
   0x1   :  { %1551 = sst [smem:[#allocation8_spill]] %s1545_s0 }
   0x2   :  { %1552 = sst [smem:[#allocation9_spill]] %s1546_s1 }
   0x3   :  { %1553 = sst [smem:[#allocation10_spill]] %s1547_s2 }
   0x4   :  { %11 = vsyncpa [#allocation3], 0 }
   0x5   :  { %13 = vsyncpa [#allocation3 + $0x1], 0 }
   0x6   :  { %14 = vsyncpa [#allocation5], 0 }
   0x7   :  { %16 = vsyncpa [#allocation5 + $0x1], 0  ;;  %s1150_s18 = smov 0   ;;  %s1152_s19 = smov 0  }
   0x8   :  { %s1154_s20 = smov 0   ;;  %s1156_s21 = smov 0  }
   0x9   :  { %s1158_s22 = smov 0   ;;  %s1160_s23 = smov 0  }
   0xa   :  { %s1162_s24 = smov 0   ;;  %s1164_s25 = smov 0  }
   0xb LB: > { %s829_s26 = sadd.s32 4294967295, %s1116_s25   ;;  %s830_s27 = sadd.s32 4294967294, %s1116_s25   ;;  %s1116_s25 = sphi %s1164_s25, %s22_s25   ;;  %s1112_s24 = sphi %s1162_s24, %s1565_s24   ;;  %s1108_s23 = sphi %s1160_s23, %s1564_s23   ;;  %s1104_s22 = sphi %s1158_s22, %s1563_s22   ;;  %s1100_s21 = sphi %s1156_s21, %s1562_s21   ;;  %s1096_s20 = sphi %s1154_s20, %s1561_s20   ;;  %s1092_s19 = sphi %s1152_s19, %s1560_s19   ;;  %s1088_s18 = sphi %s1150_s18, %s1559_s18  }
   0xc   : > { %s31_s28 = sadd.s32 1, %s1108_s23  ;;  %s34_s29 = sadd.s32 1, %s1112_s24 }
   0xd   : > { %p32_p0 = scmp.ge.s32.totalorder %s31_s28, 2  ;;  %p123_p1 = scmp.ne.s32.totalorder %s1096_s20, %s1092_s19 }
   0xe   : > { %p124_p2 = scmp.eq.s32.totalorder %s829_s26, 3  ;;  %p129_p5 = scmp.ne.s32.totalorder %s1092_s19, %s1088_s18 }
   0xf   : > { %s1567_s28 = smov (%p32_p0, %s31_s28), 0  ;;  %s1569_s29 = smov (!%p32_p0, %s34_s29), %s1112_s24 }
  0x10   : > { %s109_s30 = ssub.s32 %s1108_s23, %s1567_s28  ;;  %p1201_p3 = por %p124_p2, %p123_p1 }
  0x11   : > { %p36_p4 = scmp.ge.s32.totalorder %s1569_s29, 2  ;;  %p130_p6 = scmp.eq.s32.totalorder %s830_s27, 3 }
  0x12   : > { %p833_p7 = scmp.ge.s32.totalorder %s1116_s25, 1  ;;  %p223_p9 = scmp.lt.s32.totalorder %s1116_s25, 5 }
  0x13   : > { %s1571_s29 = smov (%p36_p4, %s1569_s29), 0  ;;  %p1210_p8 = por %p130_p6, %p129_p5 }
  0x14   : > { %s108_s8 = ssub.s32 %s1112_s24, %s1571_s29  ;;  %s113_s9 = sadd.s32 1, %s1096_s20 }
  0x15   : > { %s110_s10 = sor.u32 %s109_s30, %s108_s8  ;;  %p224_p10 = pnand %p833_p7, %p223_p9 }
  0x16   : > { %p111_p11 = scmp.eq.s32.totalorder %s110_s10, 0  ;;  %s1556_s1 = sld [smem:[#allocation9_spill]] (!%p224_p10) }
  0x17   : > { %227 = sbr.rel (%p224_p10) target bundleno = 279 (0x117), region = 32  ;;  %s1231_s26 = sshll.u32 (!%p224_p10), %s1100_s21, 4 }
  0x18   : > { %s1219_s11 = scalar_select %p111_p11, %s1096_s20, %s113_s9  }
  0x19   : > { %p270_p12 = scmp.lt.s32.totalorder (!%p224_p10), %s1104_s22, 1  ;;  %p272_p13 = scmp.lt.s32.totalorder (!%p224_p10), %s1231_s26, 31 }
  0x1a   : > { %s1557_s0 = sld [smem:[#allocation8_spill]] (!%p224_p10)  ;;  %s1339_s8 = sand.u32 (!%p224_p10), 1, %s1092_s19  }
  0x1b   : > { %s1558_s2 = sld [smem:[#allocation10_spill]] (!%p224_p10)  ;;  %s834_s21 = sshll.u32 (!%p224_p10), %s1339_s8, 7 }
  0x1c   : > { %v316_v0 = vld [vmem:[%s1556_s1 + $0x48] sm:$0xff]  ;;  %v318_v1 = vld [vmem:[%s1556_s1 + $0x58] sm:$0xff]  ;;  %v313_v2 = vld [vmem:[%s1556_s1 + $0x30] sm:$0xff]  ;;  %s271_s14 = scalar_select %p270_p12, %s1104_s22, 1  ;;  %vm327_vm0 = vcmask 261120  }
  0x1d   : > { %900 = vmatpush.msra.mxu3 %v316_v0  ;;  %518 = vmatpush.msra.mxu2 %v318_v1  ;;  %v315_v3 = vld [vmem:[%s1556_s1 + $0x40] sm:$0xff]  ;;  %v310_v4 = vld [vmem:[%s1556_s1 + $0x18] sm:$0xff]  ;;  %v312_v5 = vld [vmem:[%s1556_s1 + $0x28] sm:$0xff]  ;;  %s273_s15 = scalar_select %p272_p13, %s1231_s26, 31 }
  0x1e   : > { %388 = vmatpush.msra.mxu0 %v316_v0  ;;  %v317_v6 = vld [vmem:[%s1556_s1 + $0x50] sm:$0xff]  ;;  %v314_v7 = vld [vmem:[%s1556_s1 + $0x38] sm:$0xff]  ;;  %v307_v8 = vld [vmem:[%s1556_s1] sm:$0xff]  ;;  %s837_s10 = sshll.u32 %s271_s14, 5  ;;  %s1353_s13 = scalar_lea.vmem [#allocation2], %s834_s21 }
  0x1f   : > { %901 = vmatpush.msra.mxu3 %v313_v2  ;;  %519 = vmatpush.msra.mxu2 %v315_v3  ;;  %v309_v9 = vld [vmem:[%s1556_s1 + $0x10] sm:$0xff]  ;;  %s1258_s12 = sadd.s32 %s837_s10, %s273_s15  ;;  %v311_v10 = vld [vmem:[%s1556_s1 + $0x20] sm:$0xff]  ;;  %v308_v11 = vld [vmem:[%s1556_s1 + $0x8] sm:$0xff]  ;;  %s1356_s17 = scalar_lea.vmem [#allocation4], %s834_s21 }
  0x20   : > { %453 = vmatpush.msra.mxu1 %v317_v6  ;;  %389 = vmatpush.msra.mxu0 %v313_v2  ;;  %s838_s16 = sshll.u32 %s1258_s12, 3  ;;  %s893_s12 = sshll.u32 %s1104_s22, 5 }
  0x21   : > { %902 = vmatpush.msra.mxu3 %v310_v4  ;;  %520 = vmatpush.msra.mxu2 %v312_v5  ;;  %s1269_s14 = scalar_lea.vmem %s1557_s0, %s838_s16  ;;  %v319_v28 = vld [vmem:[%s1558_s2] sm:$0x7]  ;;  %s1364_s15 = scalar_lea.vmem %s1550_s5, %s838_s16 }
  0x22   : > { %454 = vmatpush.msra.mxu1 %v314_v7  ;;  %390 = vmatpush.msra.mxu0 %v310_v4  ;;  %v303_v12 = vld [vmem:[%s1269_s14 + $0x60] sm:$0xff]  ;;  %v304_v14 = vld [vmem:[%s1269_s14 + $0x68] sm:$0xff]  ;;  %v305_v16 = vld [vmem:[%s1269_s14 + $0x70] sm:$0xff]  ;;  %v1345_v29 = vperm.slane %v319_v28, 0  ;;  %v1347_v30 = vperm.slane %v319_v28, 1  ;;  %v1351_v35 = vperm.slane %v319_v28, 2  ;;  %s645_s16 = sadd.s32 %s893_s12, %s1231_s26 }
  0x23   : > { %903 = vmatpush.msra.mxu3 %v307_v8  ;;  %521 = vmatpush.msra.mxu2 %v309_v9  ;;  %v291_v13 = vld [vmem:[%s1269_s14] sm:$0xff]  ;;  %v292_v15 = vld [vmem:[%s1269_s14 + $0x8] sm:$0xff]  ;;  %v293_v17 = vld [vmem:[%s1269_s14 + $0x10] sm:$0xff]  ;;  %s894_s22 = sshll.u32 %s645_s16, 3  ;;  %s648_s16 = sshll.u32 %s1353_s13, 4  ;;  %s649_s16 = int_to_ptr.vmem [resolvable:$true] %s648_s16 }
  0x24   : > { %455 = vmatpush.msra.mxu1 %v311_v10  ;;  %854 = vmatmul.msk.f32.vlgmr.msra.gmra.mxu3 %vm327_vm0, %v303_v12  ;;  %v306_v18 = vld [vmem:[%s1269_s14 + $0x78] sm:$0xff]  ;;  %v295_v20 = vld [vmem:[%s1269_s14 + $0x20] sm:$0xff]  ;;  %v296_v21 = vld [vmem:[%s1269_s14 + $0x28] sm:$0xff]  ;;  %s647_s9 = scalar_lea.hbm %s1548_s3, %s894_s22  ;;  %s666_s27 = scalar_lea.hbm %s1549_s4, %s894_s22 }
  0x25   : > { %904 = vmatpush.msrb.mxu3 %v317_v6  ;;  %874 = vmatmul.msk.f32.vlgmr.msra.gmra.mxu2 %vm327_vm0, %v291_v13  ;;  %v294_v19 = vld [vmem:[%s1269_s14 + $0x18] sm:$0xff]  ;;  %v297_v22 = vld [vmem:[%s1269_s14 + $0x30] sm:$0xff]  ;;  %v299_v24 = vld [vmem:[%s1269_s14 + $0x40] sm:$0xff]  ;;  %s669_s12 = sshll.u32 %s666_s27, 4  ;;  %s667_s22 = sshll.u32 %s1356_s17, 4  ;;  %s1473_s12 = int_to_ptr.hbm [resolvable:$true] %s669_s12  ;;  %s1481_s22 = int_to_ptr.vmem [resolvable:$true] %s667_s22 }
  0x26   : > { %391 = vmatpush.msra.mxu0 %v307_v8  ;;  %456 = vmatpush.msra.mxu1 %v308_v11  ;;  %v298_v23 = vld [vmem:[%s1269_s14 + $0x38] sm:$0xff]  ;;  %v300_v25 = vld [vmem:[%s1269_s14 + $0x48] sm:$0xff]  ;;  %v301_v26 = vld [vmem:[%s1269_s14 + $0x50] sm:$0xff]  ;;  %s620_s26 = scalar_lea.sflag [#allocation3], %s1339_s8 }
  0x27   : > { %842 = vmatmul.msk.f32.vlgmr.msra.gmra.mxu0 %vm327_vm0, %v291_v13  ;;  %858 = vmatmul.msk.f32.vlgmr.msra.gmra.mxu1 %vm327_vm0, %v291_v13  ;;  %v302_v27 = vld [vmem:[%s1269_s14 + $0x58] sm:$0xff]  ;;  %s650_s14 = sshll.u32 %s647_s9, 4  ;;  %s1469_s14 = int_to_ptr.hbm [resolvable:$true] %s650_s14 }
  0x28   : > { %905 = vmatpush.msrb.mxu3 %v314_v7  ;;  %s1004_s30 = sshra.s32 %s1469_s14, 4  ;;  %s1005_s30 = int_to_ptr.hbm [resolvable:$true] %s1004_s30 }
  0x29   : > { %s1006_s9 = scalar_lea.hbm %s1005_s30, 128  ;;  %p1011_p4 = scmp.lt.s32.totalorder %s1005_s30, %s1548_s3 }
  0x2a   : > { %906 = vmatpush.msrb.mxu3 %v311_v10  ;;  %p1007_p0 = scmp.ne.s32.totalorder %s1005_s30, %s1006_s9 }
  0x2c   : > { %907 = vmatpush.msrb.mxu3 %v308_v11  ;;  %p1008_p1 = pnand %p1007_p0, %p1201_p3 }
  0x2d   : > { %855 = vmatmul.msk.f32.gmra.mxu3 %vm327_vm0, %v304_v14  ;;  %875 = vmatmul.msk.f32.gmra.mxu2 %vm327_vm0, %v292_v15 }
  0x2e   : > { %908 = vmatpush.msra.mxu3 %v318_v1  ;;  %p1009_p2 = pneg %p1008_p1 }
  0x2f   : > { %843 = vmatmul.msk.f32.gmra.mxu0 %vm327_vm0, %v292_v15  ;;  %859 = vmatmul.msk.f32.gmra.mxu1 %vm327_vm0, %v292_v15 }
  0x30   : > { %909 = vmatpush.msra.mxu3 %v315_v3 }
  0x32   : > { %910 = vmatpush.msra.mxu3 %v312_v5 }
  0x34   : > { %911 = vmatpush.msra.mxu3 %v309_v9 }
  0x35   : > { %856 = vmatmul.msk.f32.gmra.mxu3 %vm327_vm0, %v305_v16  ;;  %876 = vmatmul.msk.f32.gmra.mxu2 %vm327_vm0, %v293_v17 }
  0x37   : > { %844 = vmatmul.msk.f32.gmra.mxu0 %vm327_vm0, %v293_v17  ;;  %860 = vmatmul.msk.f32.gmra.mxu1 %vm327_vm0, %v293_v17 }
  0x3d   : > { %857 = vmatmul.msk.f32.gmra.mxu3 %vm327_vm0, %v306_v18  ;;  %877 = vmatmul.msk.f32.gmra.mxu2 %vm327_vm0, %v294_v19 }
  0x3f   : > { %845 = vmatmul.msk.f32.gmra.mxu0 %vm327_vm0, %v294_v19  ;;  %861 = vmatmul.msk.f32.gmra.mxu1 %vm327_vm0, %v294_v19 }
  0x45   : > { %870 = vmatmul.msk.f32.vlgmr.msrb.gmra.mxu3 %vm327_vm0, %v303_v12  ;;  %878 = vmatmul.msk.f32.gmra.mxu2 %vm327_vm0, %v295_v20 }
  0x47   : > { %846 = vmatmul.msk.f32.gmra.mxu0 %vm327_vm0, %v295_v20  ;;  %862 = vmatmul.msk.f32.gmra.mxu1 %vm327_vm0, %v295_v20 }
  0x4d   : > { %871 = vmatmul.msk.f32.gmra.mxu3 %vm327_vm0, %v304_v14  ;;  %879 = vmatmul.msk.f32.gmra.mxu2 %vm327_vm0, %v296_v21 }
  0x4f   : > { %847 = vmatmul.msk.f32.gmra.mxu0 %vm327_vm0, %v296_v21  ;;  %863 = vmatmul.msk.f32.gmra.mxu1 %vm327_vm0, %v296_v21 }
  0x55   : > { %872 = vmatmul.msk.f32.gmra.mxu3 %vm327_vm0, %v305_v16  ;;  %880 = vmatmul.msk.f32.gmra.mxu2 %vm327_vm0, %v297_v22 }
  0x57   : > { %848 = vmatmul.msk.f32.gmra.mxu0 %vm327_vm0, %v297_v22  ;;  %864 = vmatmul.msk.f32.gmra.mxu1 %vm327_vm0, %v297_v22 }
  0x5d   : > { %873 = vmatmul.msk.f32.gmra.mxu3 %vm327_vm0, %v306_v18  ;;  %881 = vmatmul.msk.f32.gmra.mxu2 %vm327_vm0, %v298_v23 }
  0x5f   : > { %849 = vmatmul.msk.f32.gmra.mxu0 %vm327_vm0, %v298_v23  ;;  %865 = vmatmul.msk.f32.gmra.mxu1 %vm327_vm0, %v298_v23 }
  0x65   : > { %882 = vmatmul.msk.f32.gmra.mxu2 %vm327_vm0, %v299_v24  ;;  %886 = vmatmul.msk.f32.vlgmr.msra.gmra.mxu3 %vm327_vm0, %v303_v12 }
  0x67   : > { %850 = vmatmul.msk.f32.gmra.mxu0 %vm327_vm0, %v299_v24  ;;  %866 = vmatmul.msk.f32.gmra.mxu1 %vm327_vm0, %v299_v24 }
  0x6d   : > { %883 = vmatmul.msk.f32.gmra.mxu2 %vm327_vm0, %v300_v25  ;;  %887 = vmatmul.msk.f32.gmra.mxu3 %vm327_vm0, %v304_v14 }
  0x6f   : > { %851 = vmatmul.msk.f32.gmra.mxu0 %vm327_vm0, %v300_v25  ;;  %867 = vmatmul.msk.f32.gmra.mxu1 %vm327_vm0, %v300_v25 }
  0x75   : > { %884 = vmatmul.msk.f32.gmra.mxu2 %vm327_vm0, %v301_v26  ;;  %888 = vmatmul.msk.f32.gmra.mxu3 %vm327_vm0, %v305_v16 }
  0x77   : > { %852 = vmatmul.msk.f32.gmra.mxu0 %vm327_vm0, %v301_v26  ;;  %868 = vmatmul.msk.f32.gmra.mxu1 %vm327_vm0, %v301_v26 }
  0x7d   : > { %885 = vmatmul.msk.f32.gmra.mxu2 %vm327_vm0, %v302_v27  ;;  %889 = vmatmul.msk.f32.gmra.mxu3 %vm327_vm0, %v306_v18 }
  0x7f   : > { %853 = vmatmul.msk.f32.gmra.mxu0 %vm327_vm0, %v302_v27  ;;  %869 = vmatmul.msk.f32.gmra.mxu1 %vm327_vm0, %v302_v27 }
  0xa4   : > { %v393_v31 = vpop.f32.mrf.mxu0  ;;  %v458_v32 = vpop.f32.mrf.mxu1 }
  0xa5   : > { %v394_v33 = vadd.f32 %v393_v31, %v1345_v29  ;;  %v459_v34 = vadd.f32 %v458_v32, %v1347_v30 }
  0xa7   : > { %571 = vst [vmem:[%s1353_s13] sm:$0xff] %v394_v33  ;;  %v429_v36 = vpop.f32.mrf.mxu3 }
  0xa8   : > { %587 = vst [vmem:[%s1356_s17] sm:$0xff] %v459_v34  ;;  %v523_v37 = vpop.f32.mrf.mxu2  ;;  %v430_v38 = vadd.f32 %v429_v36, %v1345_v29 }
  0xa9   : > { %v524_v39 = vadd.f32 %v523_v37, %v1351_v35 }
  0xaa   : > { %583 = vst [vmem:[%s1353_s13 + $0x60] sm:$0xff] %v430_v38 }
  0xab   : > { %603 = vst.msk [vmem:[%s1364_s15] sm:$0xff] %vm327_vm0, %v524_v39 }
  0xac   : > { %v396_v40 = vpop.f32.mrf.mxu0  ;;  %v461_v41 = vpop.f32.mrf.mxu1 }
  0xad   : > { %v397_v42 = vadd.f32 %v396_v40, %v1345_v29  ;;  %v462_v43 = vadd.f32 %v461_v41, %v1347_v30 }
  0xaf   : > { %572 = vst [vmem:[%s1353_s13 + $0x8] sm:$0xff] %v397_v42 }
  0xb0   : > { %588 = vst [vmem:[%s1356_s17 + $0x8] sm:$0xff] %v462_v43  ;;  %v432_v44 = vpop.f32.mrf.mxu3  ;;  %v526_v45 = vpop.f32.mrf.mxu2 }
  0xb1   : > { %v433_v46 = vadd.f32 %v432_v44, %v1345_v29  ;;  %v527_v47 = vadd.f32 %v526_v45, %v1351_v35 }
  0xb3   : > { %584 = vst [vmem:[%s1353_s13 + $0x68] sm:$0xff] %v433_v46 }
  0xb4   : > { %604 = vst.msk [vmem:[%s1364_s15 + $0x8] sm:$0xff] %vm327_vm0, %v527_v47  ;;  %v399_v48 = vpop.f32.mrf.mxu0  ;;  %v464_v49 = vpop.f32.mrf.mxu1 }
  0xb5   : > { %v400_v50 = vadd.f32 %v399_v48, %v1345_v29  ;;  %v465_v51 = vadd.f32 %v464_v49, %v1347_v30 }
  0xb7   : > { %573 = vst [vmem:[%s1353_s13 + $0x10] sm:$0xff] %v400_v50 }
  0xb8   : > { %589 = vst [vmem:[%s1356_s17 + $0x10] sm:$0xff] %v465_v51  ;;  %v435_v52 = vpop.f32.mrf.mxu3  ;;  %v529_v53 = vpop.f32.mrf.mxu2 }
  0xb9   : > { %v436_v54 = vadd.f32 %v435_v52, %v1345_v29  ;;  %v530_v55 = vadd.f32 %v529_v53, %v1351_v35 }
  0xbb   : > { %585 = vst [vmem:[%s1353_s13 + $0x70] sm:$0xff] %v436_v54 }
  0xbc   : > { %605 = vst.msk [vmem:[%s1364_s15 + $0x10] sm:$0xff] %vm327_vm0, %v530_v55  ;;  %v402_v56 = vpop.f32.mrf.mxu0  ;;  %v467_v57 = vpop.f32.mrf.mxu1 }
  0xbd   : > { %v403_v58 = vadd.f32 %v402_v56, %v1345_v29  ;;  %v468_v59 = vadd.f32 %v467_v57, %v1347_v30 }
  0xbf   : > { %574 = vst [vmem:[%s1353_s13 + $0x18] sm:$0xff] %v403_v58 }
  0xc0   : > { %590 = vst [vmem:[%s1356_s17 + $0x18] sm:$0xff] %v468_v59  ;;  %v438_v60 = vpop.f32.mrf.mxu3  ;;  %v532_v61 = vpop.f32.mrf.mxu2 }
  0xc1   : > { %v439_v62 = vadd.f32 %v438_v60, %v1345_v29  ;;  %v533_v63 = vadd.f32 %v532_v61, %v1351_v35 }
  0xc3   : > { %586 = vst [vmem:[%s1353_s13 + $0x78] sm:$0xff] %v439_v62 }
  0xc4   : > { %606 = vst.msk [vmem:[%s1364_s15 + $0x18] sm:$0xff] %vm327_vm0, %v533_v63  ;;  %v405_v0 = vpop.f32.mrf.mxu0  ;;  %v470_v1 = vpop.f32.mrf.mxu1 }
  0xc5   : > { %v406_v2 = vadd.f32 %v405_v0, %v1345_v29  ;;  %v471_v3 = vadd.f32 %v470_v1, %v1347_v30 }
  0xc7   : > { %575 = vst [vmem:[%s1353_s13 + $0x20] sm:$0xff] %v406_v2 }
  0xc8   : > { %591 = vst [vmem:[%s1356_s17 + $0x20] sm:$0xff] %v471_v3  ;;  %v494_v4 = vpop.f32.mrf.mxu3  ;;  %v535_v5 = vpop.f32.mrf.mxu2 }
  0xc9   : > { %v495_v6 = vadd.f32 %v494_v4, %v1347_v30  ;;  %v536_v7 = vadd.f32 %v535_v5, %v1351_v35 }
  0xcb   : > { %599 = vst [vmem:[%s1356_s17 + $0x60] sm:$0xff] %v495_v6 }
  0xcc   : > { %607 = vst.msk [vmem:[%s1364_s15 + $0x20] sm:$0xff] %vm327_vm0, %v536_v7  ;;  %v408_v8 = vpop.f32.mrf.mxu0  ;;  %v473_v9 = vpop.f32.mrf.mxu1 }
  0xcd   : > { %v409_v10 = vadd.f32 %v408_v8, %v1345_v29  ;;  %v474_v11 = vadd.f32 %v473_v9, %v1347_v30 }
  0xcf   : > { %576 = vst [vmem:[%s1353_s13 + $0x28] sm:$0xff] %v409_v10 }
  0xd0   : > { %592 = vst [vmem:[%s1356_s17 + $0x28] sm:$0xff] %v474_v11  ;;  %v497_v12 = vpop.f32.mrf.mxu3  ;;  %v538_v13 = vpop.f32.mrf.mxu2 }
  0xd1   : > { %v498_v14 = vadd.f32 %v497_v12, %v1347_v30  ;;  %v539_v15 = vadd.f32 %v538_v13, %v1351_v35 }
  0xd3   : > { %600 = vst [vmem:[%s1356_s17 + $0x68] sm:$0xff] %v498_v14 }
  0xd4   : > { %608 = vst.msk [vmem:[%s1364_s15 + $0x28] sm:$0xff] %vm327_vm0, %v539_v15  ;;  %v411_v16 = vpop.f32.mrf.mxu0  ;;  %v476_v17 = vpop.f32.mrf.mxu1 }
  0xd5   : > { %v412_v18 = vadd.f32 %v411_v16, %v1345_v29  ;;  %v477_v19 = vadd.f32 %v476_v17, %v1347_v30 }
  0xd7   : > { %577 = vst [vmem:[%s1353_s13 + $0x30] sm:$0xff] %v412_v18 }
  0xd8   : > { %593 = vst [vmem:[%s1356_s17 + $0x30] sm:$0xff] %v477_v19  ;;  %v500_v20 = vpop.f32.mrf.mxu3  ;;  %v541_v21 = vpop.f32.mrf.mxu2 }
  0xd9   : > { %v501_v22 = vadd.f32 %v500_v20, %v1347_v30  ;;  %v542_v23 = vadd.f32 %v541_v21, %v1351_v35 }
  0xdb   : > { %601 = vst [vmem:[%s1356_s17 + $0x70] sm:$0xff] %v501_v22 }
  0xdc   : > { %609 = vst.msk [vmem:[%s1364_s15 + $0x30] sm:$0xff] %vm327_vm0, %v542_v23  ;;  %v414_v24 = vpop.f32.mrf.mxu0  ;;  %v479_v25 = vpop.f32.mrf.mxu1 }
  0xdd   : > { %v415_v26 = vadd.f32 %v414_v24, %v1345_v29  ;;  %v480_v27 = vadd.f32 %v479_v25, %v1347_v30 }
  0xdf   : > { %578 = vst [vmem:[%s1353_s13 + $0x38] sm:$0xff] %v415_v26 }
  0xe0   : > { %594 = vst [vmem:[%s1356_s17 + $0x38] sm:$0xff] %v480_v27  ;;  %v503_v28 = vpop.f32.mrf.mxu3  ;;  %v544_v31 = vpop.f32.mrf.mxu2 }
  0xe1   : > { %v504_v32 = vadd.f32 %v503_v28, %v1347_v30  ;;  %v545_v33 = vadd.f32 %v544_v31, %v1351_v35 }
  0xe3   : > { %602 = vst [vmem:[%s1356_s17 + $0x78] sm:$0xff] %v504_v32 }
  0xe4   : > { %610 = vst.msk [vmem:[%s1364_s15 + $0x38] sm:$0xff] %vm327_vm0, %v545_v33  ;;  %v417_v34 = vpop.f32.mrf.mxu0  ;;  %v482_v36 = vpop.f32.mrf.mxu1 }
  0xe5   : > { %v418_v37 = vadd.f32 %v417_v34, %v1345_v29  ;;  %v483_v38 = vadd.f32 %v482_v36, %v1347_v30 }
  0xe7   : > { %579 = vst [vmem:[%s1353_s13 + $0x40] sm:$0xff] %v418_v37 }
  0xe8   : > { %595 = vst [vmem:[%s1356_s17 + $0x40] sm:$0xff] %v483_v38  ;;  %v547_v39 = vpop.f32.mrf.mxu2  ;;  %v559_v40 = vpop.f32.mrf.mxu3 }
  0xe9   : > { %v548_v41 = vadd.f32 %v547_v39, %v1351_v35  ;;  %v560_v42 = vadd.f32 %v559_v40, %v1351_v35 }
  0xeb   : > { %611 = vst.msk [vmem:[%s1364_s15 + $0x40] sm:$0xff] %vm327_vm0, %v548_v41 }
  0xec   : > { %615 = vst.msk [vmem:[%s1364_s15 + $0x60] sm:$0xff] %vm327_vm0, %v560_v42  ;;  %v420_v43 = vpop.f32.mrf.mxu0  ;;  %v485_v44 = vpop.f32.mrf.mxu1 }
  0xed   : > { %v421_v45 = vadd.f32 %v420_v43, %v1345_v29  ;;  %v486_v46 = vadd.f32 %v485_v44, %v1347_v30 }
  0xef   : > { %580 = vst [vmem:[%s1353_s13 + $0x48] sm:$0xff] %v421_v45 }
  0xf0   : > { %596 = vst [vmem:[%s1356_s17 + $0x48] sm:$0xff] %v486_v46  ;;  %v550_v47 = vpop.f32.mrf.mxu2  ;;  %v562_v48 = vpop.f32.mrf.mxu3 }
  0xf1   : > { %v551_v49 = vadd.f32 %v550_v47, %v1351_v35  ;;  %v563_v50 = vadd.f32 %v562_v48, %v1351_v35 }
  0xf3   : > { %612 = vst.msk [vmem:[%s1364_s15 + $0x48] sm:$0xff] %vm327_vm0, %v551_v49 }
  0xf4   : > { %616 = vst.msk [vmem:[%s1364_s15 + $0x68] sm:$0xff] %vm327_vm0, %v563_v50  ;;  %v423_v51 = vpop.f32.mrf.mxu0  ;;  %v488_v52 = vpop.f32.mrf.mxu1 }
  0xf5   : > { %v424_v53 = vadd.f32 %v423_v51, %v1345_v29  ;;  %v489_v54 = vadd.f32 %v488_v52, %v1347_v30 }
  0xf7   : > { %581 = vst [vmem:[%s1353_s13 + $0x50] sm:$0xff] %v424_v53 }
  0xf8   : > { %597 = vst [vmem:[%s1356_s17 + $0x50] sm:$0xff] %v489_v54  ;;  %v553_v55 = vpop.f32.mrf.mxu2  ;;  %v565_v56 = vpop.f32.mrf.mxu3 }
  0xf9   : > { %v554_v57 = vadd.f32 %v553_v55, %v1351_v35  ;;  %v566_v58 = vadd.f32 %v565_v56, %v1351_v35 }
  0xfb   : > { %613 = vst.msk [vmem:[%s1364_s15 + $0x50] sm:$0xff] %vm327_vm0, %v554_v57 }
  0xfc   : > { %617 = vst.msk [vmem:[%s1364_s15 + $0x70] sm:$0xff] %vm327_vm0, %v566_v58  ;;  %v426_v59 = vpop.f32.mrf.mxu0  ;;  %v491_v60 = vpop.f32.mrf.mxu1 }
  0xfd   : > { %v427_v61 = vadd.f32 %v426_v59, %v1345_v29  ;;  %v492_v62 = vadd.f32 %v491_v60, %v1347_v30 }
  0xff   : > { %582 = vst [vmem:[%s1353_s13 + $0x58] sm:$0xff] %v427_v61  ;;  %s1010_s13 = scalar_lea.hbm %s1548_s3, 512 }
 0x100   : > { %598 = vst [vmem:[%s1356_s17 + $0x58] sm:$0xff] %v492_v62  ;;  %v556_v63 = vpop.f32.mrf.mxu2  ;;  %v568_v0 = vpop.f32.mrf.mxu3  ;;  %p1012_p5 = scmp.lt.s32.totalorder %s1010_s13, %s1006_s9 }
 0x101   : > { %v557_v1 = vadd.f32 %v556_v63, %v1351_v35  ;;  %v569_v2 = vadd.f32 %v568_v0, %v1351_v35 }
 0x102   : > { %p1013_p6 = por %p1012_p5, %p1011_p4 }
 0x104   : > { %p1014_p7 = pnand %p1013_p6, %p1009_p2 }
 0x106   : > { %1017 = shalt.err (!%p1014_p7)
}
 0x107   : > { %s1118_s0 = smov 128   ;;  %s1119_s1 = smov 8  }
 0x108   : > { %912 = dma.vmem_to_hbm [thread:$0]  (%p1201_p3), %s649_s16, 2048, %s1469_s14, %s620_s26, %s1118_s0, %s1118_s0, %s1119_s1  }
 0x109   : > { %s625_s2 = scalar_lea.sflag [#allocation5], %s1339_s8  ;;  %s1032_s10 = sshra.s32 %s1473_s12, 4  ;;  %s1033_s10 = int_to_ptr.hbm [resolvable:$true] %s1032_s10 }
 0x10a   : > { %s1034_s21 = scalar_lea.hbm %s1033_s10, 128  ;;  %s1038_s13 = scalar_lea.hbm %s1549_s4, 512 }
 0x10b   : > { %p1035_p9 = scmp.ne.s32.totalorder %s1033_s10, %s1034_s21  ;;  %p1039_p12 = scmp.lt.s32.totalorder %s1033_s10, %s1549_s4 }
 0x10c   : > { %p1040_p13 = scmp.lt.s32.totalorder %s1038_s13, %s1034_s21 }
 0x10d   : > { %p1036_p10 = pnand %p1035_p9, %p1201_p3 }
 0x10e   : > { %p1041_p0 = por %p1040_p13, %p1039_p12 }
 0x10f   : > { %p1037_p11 = pneg %p1036_p10 }
 0x111   : > { %p1042_p1 = pnand %p1041_p0, %p1037_p11 }
 0x113   : > { %1045 = shalt.err (!%p1042_p1)
}
 0x114   : > { %913 = dma.vmem_to_hbm [thread:$0]  (%p1201_p3), %s1481_s22, 2048, %s1473_s12, %s625_s2, %s1118_s0, %s1118_s0, %s1119_s1  }
 0x115   : > { %614 = vst.msk [vmem:[%s1364_s15 + $0x58] sm:$0xff] %vm327_vm0, %v557_v1 }
 0x116   : > { %618 = vst.msk [vmem:[%s1364_s15 + $0x78] sm:$0xff] %vm327_vm0, %v569_v2 }
 0x117 PF: > { %p923_p2 = scmp.ge.s32.totalorder %s1116_s25, 2  ;;  %s688_s8 = sand.u32 1, %s1088_s18  }
 0x118   : > { %s689_s14 = scalar_lea.sflag [#allocation3], %s688_s8 }
 0x119   : > { %p917_p4 = pnand %p923_p2, %p1210_p8 }
 0x11b   : > { %p918_p5 = pneg %p917_p4 }
 0x11d   : > { %1079 = dma.done.wait (%p918_p5), %s689_s14, 2048  }
 0x11e   : > { %1081 = vsyncadd (%p918_p5), %s689_s14, 4294965248  ;;  %s699_s6 = scalar_lea.sflag [#allocation5], %s688_s8 }
 0x11f   : > { %1083 = dma.done.wait (%p918_p5), %s699_s6, 2048  }
 0x120   : > { %1085 = vsyncadd (%p918_p5), %s699_s6, 4294965248  ;;  %s22_s25 = sadd.s32 1, %s1116_s25   ;;  %s1559_s18 = smov %s1092_s19 }
 0x121   : > { %p19_p3 = scmp.ge.s32.totalorder %s22_s25, 6   ;;  %s1560_s19 = smov %s1096_s20 }
 0x122   : > { %s1561_s20 = smov %s1219_s11  ;;  %s1562_s21 = smov %s1108_s23 }
 0x123   : > { %s1563_s22 = smov %s1112_s24  ;;  %s1564_s23 = smov %s1567_s28 }
 0x124   : > { %s1565_s24 = smov %s1571_s29  ;;  %21 = sbr.rel (!%p19_p3) target bundleno = 11 (0xb), region = 96 }
 0x129   :  { %717 = vsyncpa [#allocation3], 1 }
 0x12a   :  { %719 = vsyncpa [#allocation3 + $0x1], 1 }
 0x12b   :  { %720 = vsyncpa [#allocation5], 1 }
 0x12c   :  { %722 = vsyncpa [#allocation5 + $0x1], 1 }

</bundles_post_ra>
